<compile_context>
chip_gen: v7x
topology: tpu7x:2x2x1
jax: 0.10.0
libtpu: 0.0.40
codegen_flags: <defaults>
</compile_context>

<pallas_src>
import functools

import numpy as np
import jax
import jax.numpy as jnp
from jax import lax
from jax.experimental import pallas as pl
from jax.experimental.pallas import tpu as pltpu


def _node_unit_kernel(*refs, mix, n_in, W, HW, Bt):
    """One grid step: Bt batch elements, layout (Bt, C, H*W) with H*W on lanes."""
    x_refs = refs[:n_in]
    masks_ref, dww_ref, pww_ref, shift_ref, out_ref = refs[n_in:]

    dw = dww_ref[...]        # (Cin, 9)
    masks = masks_ref[...]   # (9, HW) 0/1 boundary masks (precomputed host-side)
    pww = pww_ref[...]       # (Cout, Cin), BN scale folded in
    shift = shift_ref[...]   # (Cout, 1), dw-bias + pw-bias + BN shift folded

    # 3x3 taps (minus center); per-tap lane shift and boundary-masked dw
    # coefficient, hoisted out of the batch loop (grid-step invariant work).
    taps = [(ky, kx) for ky in range(3) for kx in range(3) if (ky, kx) != (1, 1)]
    shifts = [(-((ky - 1) * W + (kx - 1))) % HW for ky, kx in taps]
    coefs = [dw[:, ky * 3 + kx:ky * 3 + kx + 1]
             * masks[ky * 3 + kx:ky * 3 + kx + 1, :]          # (Cin, HW)
             for ky, kx in taps]
    w_center = dw[:, 4:5]

    for i in range(Bt):
        # 1) weighted sum of the in-degree inputs.  Mixing weights are
        #    compile-time constants; the self-edge (weight 1.0) skips its mul.
        xm = None
        for n in range(n_in):
            x = x_refs[n][i]                       # (Cin, HW)
            t = x if mix[n] == 1.0 else x * mix[n]
            xm = t if xm is None else xm + t

        # 2) depthwise 3x3 conv, stride 1, zero pad 1.  Each off-center tap is
        #    an XLU lane roll of the flattened image times a boundary-masked
        #    coefficient; two independent accumulator chains halve the serial
        #    mul+add dependency path.
        acc0 = xm * w_center                       # center tap (ky=1, kx=1)
        acc1 = None
        for t_i in range(8):
            shifted = pltpu.roll(xm, shift=shifts[t_i], axis=1)
            term = shifted * coefs[t_i]
            if t_i % 2 == 0:
                acc0 = acc0 + term
            else:
                acc1 = term if acc1 is None else acc1 + term
        acc = acc0 + acc1                          # (Cin, HW)

        # 3) pointwise 1x1 conv (BN scale pre-folded into weights) on the
        #    otherwise-idle MXU; HIGHEST precision keeps f32 parity.
        z = jnp.dot(pww, acc, preferred_element_type=jnp.float32,
                    precision=lax.Precision.HIGHEST)

        # 4) folded shift (dw bias + pw bias + BN shift), then ReLU.
        out_ref[i] = jnp.maximum(z + shift, 0.0)


def _pick_batch_tile(B, Cin, Cout, HW, n_in):
    """Largest batch tile that (a) divides B, (b) keeps >= 2 grid steps when
    B >= 2 (so both v7x TensorCores get work), and (c) stays well under the
    32 MiB default scoped-VMEM budget once double-buffering is counted."""
    bytes_per_elem = 4 * HW * (n_in * Cin + Cout)      # f32 inputs + output
    cap_bytes = 8 << 20                                # ~16 MiB double-buffered
    bt = 1
    for cand in range(1, min(B, 64) + 1):              # 64: unrolled-loop cap
        if B % cand:
            continue
        if cand * bytes_per_elem > cap_bytes:
            continue
        if B >= 2 and B // cand < 2:
            continue
        bt = cand
    return bt


@functools.lru_cache(maxsize=None)
def _tap_masks_np(H, W):
    """(9, H*W) 0/1 masks: tap (ky,kx) valid at output position (r,c)."""
    HW = H * W
    row = np.arange(HW) // W
    col = np.arange(HW) % W
    masks = np.ones((9, HW), np.float32)
    for ky in range(3):
        for kx in range(3):
            dy, dx = ky - 1, kx - 1
            m = np.ones(HW, bool)
            if dy == -1:
                m &= row >= 1
            elif dy == 1:
                m &= row < H - 1
            if dx == -1:
                m &= col >= 1
            elif dx == 1:
                m &= col < W - 1
            masks[ky * 3 + kx] = m.astype(np.float32)
    return masks


def unit_forward(x_list, mix, params):
    """x_list: list of NCHW f32 arrays; mix: sequence of Python-float weights."""
    n_in = len(x_list)
    B, Cin, H, W = x_list[0].shape
    HW = H * W
    Cout = params["pw_w_scaled"].shape[0]
    Bt = _pick_batch_tile(B, Cin, Cout, HW, n_in)

    xs = [x.reshape(B, Cin, HW) for x in x_list]       # free reshape of NCHW
    masks = jnp.asarray(_tap_masks_np(H, W))

    kernel = functools.partial(
        _node_unit_kernel, mix=tuple(float(m) for m in mix),
        n_in=n_in, W=W, HW=HW, Bt=Bt)

    in_specs = [pl.BlockSpec((Bt, Cin, HW), lambda b: (b, 0, 0))
                for _ in range(n_in)]                  # batched input tiles
    in_specs += [
        pl.BlockSpec((9, HW), lambda b: (0, 0)),       # boundary masks (invariant)
        pl.BlockSpec((Cin, 9), lambda b: (0, 0)),      # dw weights
        pl.BlockSpec((Cout, Cin), lambda b: (0, 0)),   # pw weights * bn_scale
        pl.BlockSpec((Cout, 1), lambda b: (0, 0)),     # fused shift
    ]

    out = pl.pallas_call(
        kernel,
        out_shape=jax.ShapeDtypeStruct((B, Cout, HW), jnp.float32),
        grid=(B // Bt,),
        in_specs=in_specs,
        out_specs=pl.BlockSpec((Bt, Cout, HW), lambda b: (b, 0, 0)),
        compiler_params=pltpu.CompilerParams(dimension_semantics=("parallel",)),
    )(*xs, masks, params["dw_w"], params["pw_w_scaled"], params["fused_shift"])

    return out.reshape(B, Cout, H, W)  # back to NCHW (free reshape)


def node_forward(inputs, itself, in_channels, out_channels, params):
    """Mirrors Node.forward: returns (out, temp)."""
    n_in = len(inputs)
    temp = 0.5 * np.ones((n_in,), np.float32)
    if itself > -1:
        temp[itself] = 1.0

    if n_in > 1:
        mix = [0.5] * n_in
        if itself >= 0:
            mix[itself] = 1.0          # input[itself] is added unweighted
        if in_channels == out_channels + 100:
            out = sum(jnp.float32(w) * x for w, x in zip(mix, inputs))
        else:
            out = unit_forward(list(inputs), mix, params)
    else:
        if in_channels == out_channels + 100:
            out = inputs[0]
        else:
            out = unit_forward([inputs[0]], [1.0], params)

    return out, jnp.asarray(temp)


def init_params(key, in_channels, out_channels):
    """Deterministic parameter init matching the PyTorch module's shapes."""
    k1, k2, k3, k4 = jax.random.split(key, 4)
    fan_dw = 1 * 3 * 3
    dw_w_t = jax.random.uniform(k1, (in_channels, 1, 3, 3), jnp.float32,
                                -1.0, 1.0) / np.sqrt(fan_dw)
    dw_b = jax.random.uniform(k2, (in_channels,), jnp.float32,
                              -1.0, 1.0) / np.sqrt(fan_dw)
    fan_pw = in_channels
    pw_w_t = jax.random.uniform(k3, (out_channels, in_channels, 1, 1),
                                jnp.float32, -1.0, 1.0) / np.sqrt(fan_pw)
    pw_b = jax.random.uniform(k4, (out_channels,), jnp.float32,
                              -1.0, 1.0) / np.sqrt(fan_pw)
    # BatchNorm2d default init, eval mode: gamma=1, beta=0, mean=0, var=1
    eps = 1e-5
    gamma = jnp.ones((out_channels,), jnp.float32)
    beta = jnp.zeros((out_channels,), jnp.float32)
    mean = jnp.zeros((out_channels,), jnp.float32)
    var = jnp.ones((out_channels,), jnp.float32)
    bn_scale = gamma / jnp.sqrt(var + eps)
    bn_shift = beta - mean * bn_scale

    pw_w_2d = pw_w_t[:, :, 0, 0]                                  # (Cout, Cin)
    # Fold depthwise bias through the pointwise conv, and pw bias + BN into a
    # single per-output-channel affine:  y = (pw_w*bn_scale) @ dwconv(x) + shift
    fused_shift = bn_scale * (pw_w_2d @ dw_b + pw_b) + bn_shift    # (Cout,)
    return {
        # kernel-layout params (biases / BN pre-folded)
        "dw_w": dw_w_t[:, 0].reshape(in_channels, 9),              # (Cin, 9)
        "pw_w_scaled": pw_w_2d * bn_scale[:, None],                # (Cout, Cin)
        "fused_shift": fused_shift.reshape(out_channels, 1),       # (Cout, 1)
        # torch-layout copies, only for the pure-JAX reference check
        "_dw_w_torch": dw_w_t,
        "_dw_b": dw_b,
        "_pw_w_torch": pw_w_t,
        "_pw_b": pw_b,
        "_bn_scale": bn_scale,
        "_bn_shift": bn_shift,
    }


def node_reference(inputs, itself, in_channels, out_channels, params):
    """Pure-JAX reference of Node.forward's tensor output (eval mode)."""
    n_in = len(inputs)
    if n_in > 1:
        w = [0.5] * n_in
        if itself >= 0:
            w[itself] = 1.0
        x = sum(wi * xi for wi, xi in zip(w, inputs))
    else:
        x = inputs[0]
    if in_channels == out_channels + 100:
        return x
    y = lax.conv_general_dilated(
        x, params["_dw_w_torch"], (1, 1), ((1, 1), (1, 1)),
        dimension_numbers=("NCHW", "OIHW", "NCHW"),
        feature_group_count=in_channels, precision=lax.Precision.HIGHEST)
    y = y + params["_dw_b"].reshape(1, in_channels, 1, 1)
    y = lax.conv_general_dilated(
        y, params["_pw_w_torch"], (1, 1), ((0, 0), (0, 0)),
        dimension_numbers=("NCHW", "OIHW", "NCHW"),
        precision=lax.Precision.HIGHEST)
    y = y + params["_pw_b"].reshape(1, out_channels, 1, 1)
    y = y * params["_bn_scale"].reshape(1, out_channels, 1, 1) \
        + params["_bn_shift"].reshape(1, out_channels, 1, 1)
    return jnp.maximum(y, 0.0)


if __name__ == "__main__":
    Cin, Cout, H, W = 8, 16, 16, 16
    n_in, itself = 3, 1                      # len(in_degree)=3, self-edge at idx 1

    key = jax.random.PRNGKey(0)
    kp, *kx = jax.random.split(key, 1 + 2 * n_in)
    params = init_params(kp, Cin, Cout)

    # Small-batch check: B=2 -> Bt=1, grid=(2,) (both v7x TensorCores busy).
    inputs = [jax.random.normal(k, (2, Cin, H, W), jnp.float32) for k in kx[:n_in]]
    out, temp = node_forward(inputs, itself, Cin, Cout, params)
    out = jax.block_until_ready(out)
    ref = node_reference(inputs, itself, Cin, Cout, params)
    assert out.shape == (2, Cout, H, W), out.shape
    assert np.allclose(np.asarray(out), np.asarray(ref), atol=1e-4, rtol=1e-4), \
        float(jnp.max(jnp.abs(out - ref)))
    assert np.allclose(np.asarray(temp),
                       np.array([0.5, 1.0, 0.5], np.float32))

    # Larger-batch check exercising the multi-element batch tile (B=8 -> Bt=4).
    inputs8 = [jax.random.normal(k, (8, Cin, H, W), jnp.float32) for k in kx[n_in:]]
    out8, _ = node_forward(inputs8, itself, Cin, Cout, params)
    out8 = jax.block_until_ready(out8)
    ref8 = node_reference(inputs8, itself, Cin, Cout, params)
    assert np.allclose(np.asarray(out8), np.asarray(ref8), atol=1e-4, rtol=1e-4), \
        float(jnp.max(jnp.abs(out8 - ref8)))

    print("KERNEL_OK")
</pallas_src>

<mosaic_0001>
module attributes {stable_mosaic.version = 11 : i64} {
  func.func @_node_unit_kernel(%arg0: i32, %arg1: memref<1x8x256xf32, #tpu.memory_space<vmem>>, %arg2: memref<1x8x256xf32, #tpu.memory_space<vmem>>, %arg3: memref<1x8x256xf32, #tpu.memory_space<vmem>>, %arg4: memref<9x256xf32, #tpu.memory_space<vmem>>, %arg5: memref<8x9xf32, #tpu.memory_space<vmem>>, %arg6: memref<16x8xf32, #tpu.memory_space<vmem>>, %arg7: memref<16x1xf32, #tpu.memory_space<vmem>>, %arg8: memref<1x16x256xf32, #tpu.memory_space<vmem>>) attributes {dimension_semantics = [#tpu.dimension_semantics<parallel>], iteration_bounds = array<i64: 2>, scalar_prefetch = 0 : i64, scratch_operands = 0 : i64, tpu.core_type = #tpu.core_type<tc>, window_params = [{transform_indices = @transform_0, window_bounds = array<i64: 1, 8, 256>}, {transform_indices = @transform_1, window_bounds = array<i64: 1, 8, 256>}, {transform_indices = @transform_2, window_bounds = array<i64: 1, 8, 256>}, {pipeline_mode = #tpu.pipeline_mode<synchronous>, transform_indices = @transform_3, window_bounds = array<i64: 9, 256>}, {pipeline_mode = #tpu.pipeline_mode<synchronous>, transform_indices = @transform_4, window_bounds = array<i64: 8, 9>}, {pipeline_mode = #tpu.pipeline_mode<synchronous>, transform_indices = @transform_5, window_bounds = array<i64: 16, 8>}, {pipeline_mode = #tpu.pipeline_mode<synchronous>, transform_indices = @transform_6, window_bounds = array<i64: 16, 1>}, {transform_indices = @transform_7, window_bounds = array<i64: 1, 16, 256>}]} {
    %c0 = arith.constant 0 : index
    %c0_0 = arith.constant 0 : index
    %0 = vector.load %arg5[%c0, %c0_0] : memref<8x9xf32, #tpu.memory_space<vmem>>, vector<8x9xf32>
    %c0_1 = arith.constant 0 : index
    %c0_2 = arith.constant 0 : index
    %1 = vector.load %arg4[%c0_1, %c0_2] : memref<9x256xf32, #tpu.memory_space<vmem>>, vector<9x256xf32>
    %c0_3 = arith.constant 0 : index
    %c0_4 = arith.constant 0 : index
    %2 = vector.load %arg6[%c0_3, %c0_4] : memref<16x8xf32, #tpu.memory_space<vmem>>, vector<16x8xf32>
    %c0_5 = arith.constant 0 : index
    %c0_6 = arith.constant 0 : index
    %3 = vector.load %arg7[%c0_5, %c0_6] : memref<16x1xf32, #tpu.memory_space<vmem>>, vector<16x1xf32>
    %4 = vector.extract_strided_slice %0 {offsets = [0, 0], sizes = [8, 1], strides = [1, 1]} : vector<8x9xf32> to vector<8x1xf32>
    %5 = vector.extract_strided_slice %1 {offsets = [0, 0], sizes = [1, 256], strides = [1, 1]} : vector<9x256xf32> to vector<1x256xf32>
    %6 = vector.broadcast %4 : vector<8x1xf32> to vector<8x256xf32>
    %7 = vector.broadcast %5 : vector<1x256xf32> to vector<8x256xf32>
    %8 = arith.mulf %6, %7 : vector<8x256xf32>
    %9 = vector.extract_strided_slice %0 {offsets = [0, 1], sizes = [8, 1], strides = [1, 1]} : vector<8x9xf32> to vector<8x1xf32>
    %10 = vector.extract_strided_slice %1 {offsets = [1, 0], sizes = [1, 256], strides = [1, 1]} : vector<9x256xf32> to vector<1x256xf32>
    %11 = vector.broadcast %9 : vector<8x1xf32> to vector<8x256xf32>
    %12 = vector.broadcast %10 : vector<1x256xf32> to vector<8x256xf32>
    %13 = arith.mulf %11, %12 : vector<8x256xf32>
    %14 = vector.extract_strided_slice %0 {offsets = [0, 2], sizes = [8, 1], strides = [1, 1]} : vector<8x9xf32> to vector<8x1xf32>
    %15 = vector.extract_strided_slice %1 {offsets = [2, 0], sizes = [1, 256], strides = [1, 1]} : vector<9x256xf32> to vector<1x256xf32>
    %16 = vector.broadcast %14 : vector<8x1xf32> to vector<8x256xf32>
    %17 = vector.broadcast %15 : vector<1x256xf32> to vector<8x256xf32>
    %18 = arith.mulf %16, %17 : vector<8x256xf32>
    %19 = vector.extract_strided_slice %0 {offsets = [0, 3], sizes = [8, 1], strides = [1, 1]} : vector<8x9xf32> to vector<8x1xf32>
    %20 = vector.extract_strided_slice %1 {offsets = [3, 0], sizes = [1, 256], strides = [1, 1]} : vector<9x256xf32> to vector<1x256xf32>
    %21 = vector.broadcast %19 : vector<8x1xf32> to vector<8x256xf32>
    %22 = vector.broadcast %20 : vector<1x256xf32> to vector<8x256xf32>
    %23 = arith.mulf %21, %22 : vector<8x256xf32>
    %24 = vector.extract_strided_slice %0 {offsets = [0, 5], sizes = [8, 1], strides = [1, 1]} : vector<8x9xf32> to vector<8x1xf32>
    %25 = vector.extract_strided_slice %1 {offsets = [5, 0], sizes = [1, 256], strides = [1, 1]} : vector<9x256xf32> to vector<1x256xf32>
    %26 = vector.broadcast %24 : vector<8x1xf32> to vector<8x256xf32>
    %27 = vector.broadcast %25 : vector<1x256xf32> to vector<8x256xf32>
    %28 = arith.mulf %26, %27 : vector<8x256xf32>
    %29 = vector.extract_strided_slice %0 {offsets = [0, 6], sizes = [8, 1], strides = [1, 1]} : vector<8x9xf32> to vector<8x1xf32>
    %30 = vector.extract_strided_slice %1 {offsets = [6, 0], sizes = [1, 256], strides = [1, 1]} : vector<9x256xf32> to vector<1x256xf32>
    %31 = vector.broadcast %29 : vector<8x1xf32> to vector<8x256xf32>
    %32 = vector.broadcast %30 : vector<1x256xf32> to vector<8x256xf32>
    %33 = arith.mulf %31, %32 : vector<8x256xf32>
    %34 = vector.extract_strided_slice %0 {offsets = [0, 7], sizes = [8, 1], strides = [1, 1]} : vector<8x9xf32> to vector<8x1xf32>
    %35 = vector.extract_strided_slice %1 {offsets = [7, 0], sizes = [1, 256], strides = [1, 1]} : vector<9x256xf32> to vector<1x256xf32>
    %36 = vector.broadcast %34 : vector<8x1xf32> to vector<8x256xf32>
    %37 = vector.broadcast %35 : vector<1x256xf32> to vector<8x256xf32>
    %38 = arith.mulf %36, %37 : vector<8x256xf32>
    %39 = vector.extract_strided_slice %0 {offsets = [0, 8], sizes = [8, 1], strides = [1, 1]} : vector<8x9xf32> to vector<8x1xf32>
    %40 = vector.extract_strided_slice %1 {offsets = [8, 0], sizes = [1, 256], strides = [1, 1]} : vector<9x256xf32> to vector<1x256xf32>
    %41 = vector.broadcast %39 : vector<8x1xf32> to vector<8x256xf32>
    %42 = vector.broadcast %40 : vector<1x256xf32> to vector<8x256xf32>
    %43 = arith.mulf %41, %42 : vector<8x256xf32>
    %44 = vector.extract_strided_slice %0 {offsets = [0, 4], sizes = [8, 1], strides = [1, 1]} : vector<8x9xf32> to vector<8x1xf32>
    %c0_7 = arith.constant 0 : index
    %c0_8 = arith.constant 0 : index
    %c0_9 = arith.constant 0 : index
    %45 = vector.load %arg1[%c0_7, %c0_8, %c0_9] : memref<1x8x256xf32, #tpu.memory_space<vmem>>, vector<1x8x256xf32>
    %46 = vector.shape_cast %45 : vector<1x8x256xf32> to vector<8x256xf32>
    %cst = arith.constant 5.000000e-01 : f32
    %47 = vector.broadcast %cst : f32 to vector<8x256xf32>
    %48 = arith.mulf %46, %47 : vector<8x256xf32>
    %c0_10 = arith.constant 0 : index
    %c0_11 = arith.constant 0 : index
    %c0_12 = arith.constant 0 : index
    %49 = vector.load %arg2[%c0_10, %c0_11, %c0_12] : memref<1x8x256xf32, #tpu.memory_space<vmem>>, vector<1x8x256xf32>
    %50 = vector.shape_cast %49 : vector<1x8x256xf32> to vector<8x256xf32>
    %51 = arith.addf %48, %50 : vector<8x256xf32>
    %c0_13 = arith.constant 0 : index
    %c0_14 = arith.constant 0 : index
    %c0_15 = arith.constant 0 : index
    %52 = vector.load %arg3[%c0_13, %c0_14, %c0_15] : memref<1x8x256xf32, #tpu.memory_space<vmem>>, vector<1x8x256xf32>
    %53 = vector.shape_cast %52 : vector<1x8x256xf32> to vector<8x256xf32>
    %cst_16 = arith.constant 5.000000e-01 : f32
    %54 = vector.broadcast %cst_16 : f32 to vector<8x256xf32>
    %55 = arith.mulf %53, %54 : vector<8x256xf32>
    %56 = arith.addf %51, %55 : vector<8x256xf32>
    %57 = vector.broadcast %44 : vector<8x1xf32> to vector<8x256xf32>
    %58 = arith.mulf %56, %57 : vector<8x256xf32>
    %c17_i32 = arith.constant 17 : i32
    %59 = tpu.dynamic_rotate %56 by %c17_i32 dim 1 : vector<8x256xf32>, i32 -> vector<8x256xf32>
    %60 = arith.mulf %59, %8 : vector<8x256xf32>
    %61 = arith.addf %58, %60 : vector<8x256xf32>
    %c16_i32 = arith.constant 16 : i32
    %62 = tpu.dynamic_rotate %56 by %c16_i32 dim 1 : vector<8x256xf32>, i32 -> vector<8x256xf32>
    %63 = arith.mulf %62, %13 : vector<8x256xf32>
    %c15_i32 = arith.constant 15 : i32
    %64 = tpu.dynamic_rotate %56 by %c15_i32 dim 1 : vector<8x256xf32>, i32 -> vector<8x256xf32>
    %65 = arith.mulf %64, %18 : vector<8x256xf32>
    %66 = arith.addf %61, %65 : vector<8x256xf32>
    %c1_i32 = arith.constant 1 : i32
    %67 = tpu.dynamic_rotate %56 by %c1_i32 dim 1 : vector<8x256xf32>, i32 -> vector<8x256xf32>
    %68 = arith.mulf %67, %23 : vector<8x256xf32>
    %69 = arith.addf %63, %68 : vector<8x256xf32>
    %c255_i32 = arith.constant 255 : i32
    %70 = tpu.dynamic_rotate %56 by %c255_i32 dim 1 : vector<8x256xf32>, i32 -> vector<8x256xf32>
    %71 = arith.mulf %70, %28 : vector<8x256xf32>
    %72 = arith.addf %66, %71 : vector<8x256xf32>
    %c241_i32 = arith.constant 241 : i32
    %73 = tpu.dynamic_rotate %56 by %c241_i32 dim 1 : vector<8x256xf32>, i32 -> vector<8x256xf32>
    %74 = arith.mulf %73, %33 : vector<8x256xf32>
    %75 = arith.addf %69, %74 : vector<8x256xf32>
    %c240_i32 = arith.constant 240 : i32
    %76 = tpu.dynamic_rotate %56 by %c240_i32 dim 1 : vector<8x256xf32>, i32 -> vector<8x256xf32>
    %77 = arith.mulf %76, %38 : vector<8x256xf32>
    %78 = arith.addf %72, %77 : vector<8x256xf32>
    %c239_i32 = arith.constant 239 : i32
    %79 = tpu.dynamic_rotate %56 by %c239_i32 dim 1 : vector<8x256xf32>, i32 -> vector<8x256xf32>
    %80 = arith.mulf %79, %43 : vector<8x256xf32>
    %81 = arith.addf %75, %80 : vector<8x256xf32>
    %82 = arith.addf %78, %81 : vector<8x256xf32>
    %cst_17 = arith.constant dense<0.000000e+00> : vector<16x256xf32>
    %83 = tpu.matmul %2, %82, %cst_17 {dimension_numbers = #tpu.dot_dimension_numbers<[1], [0], [0], [1], [0, 0, 1, 1], [], []>, precision = #tpu.contract_precision<fp32>} : vector<16x8xf32>, vector<8x256xf32>, vector<16x256xf32> -> vector<16x256xf32>
    %84 = vector.broadcast %3 : vector<16x1xf32> to vector<16x256xf32>
    %85 = arith.addf %83, %84 : vector<16x256xf32>
    %cst_18 = arith.constant 0.000000e+00 : f32
    %86 = vector.broadcast %cst_18 : f32 to vector<16x256xf32>
    %87 = arith.maximumf %85, %86 : vector<16x256xf32>
    %c0_19 = arith.constant 0 : index
    %c0_20 = arith.constant 0 : index
    %c0_21 = arith.constant 0 : index
    %88 = vector.load %arg8[%c0_19, %c0_20, %c0_21] : memref<1x16x256xf32, #tpu.memory_space<vmem>>, vector<1x16x256xf32>
    %89 = vector.shape_cast %88 : vector<1x16x256xf32> to vector<16x256xf32>
    %90 = vector.shape_cast %87 : vector<16x256xf32> to vector<1x16x256xf32>
    tpu.vector_store %arg8[%c0_19, %c0_20, %c0_21], %90 {strides = array<i32>} : memref<1x16x256xf32, #tpu.memory_space<vmem>>, vector<1x16x256xf32>,
    return
  }
  func.func @transform_0(%arg0: i32) -> (i32, i32, i32) {
    %c0_i32 = arith.constant 0 : i32
    %c0_i32_0 = arith.constant 0 : i32
    %c0_i32_1 = arith.constant 0 : i32
    return %arg0, %c0_i32, %c0_i32_0 : i32, i32, i32
  }
  func.func @transform_1(%arg0: i32) -> (i32, i32, i32) {
    %c0_i32 = arith.constant 0 : i32
    %c0_i32_0 = arith.constant 0 : i32
    %c0_i32_1 = arith.constant 0 : i32
    return %arg0, %c0_i32, %c0_i32_0 : i32, i32, i32
  }
  func.func @transform_2(%arg0: i32) -> (i32, i32, i32) {
    %c0_i32 = arith.constant 0 : i32
    %c0_i32_0 = arith.constant 0 : i32
    %c0_i32_1 = arith.constant 0 : i32
    return %arg0, %c0_i32, %c0_i32_0 : i32, i32, i32
  }
  func.func @transform_3(%arg0: i32) -> (i32, i32) {
    %c0_i32 = arith.constant 0 : i32
    %c0_i32_0 = arith.constant 0 : i32
    %c0_i32_1 = arith.constant 0 : i32
    return %c0_i32, %c0_i32_0 : i32, i32
  }
  func.func @transform_4(%arg0: i32) -> (i32, i32) {
    %c0_i32 = arith.constant 0 : i32
    %c0_i32_0 = arith.constant 0 : i32
    %c0_i32_1 = arith.constant 0 : i32
    return %c0_i32, %c0_i32_0 : i32, i32
  }
  func.func @transform_5(%arg0: i32) -> (i32, i32) {
    %c0_i32 = arith.constant 0 : i32
    %c0_i32_0 = arith.constant 0 : i32
    %c0_i32_1 = arith.constant 0 : i32
    return %c0_i32, %c0_i32_0 : i32, i32
  }
  func.func @transform_6(%arg0: i32) -> (i32, i32) {
    %c0_i32 = arith.constant 0 : i32
    %c0_i32_0 = arith.constant 0 : i32
    %c0_i32_1 = arith.constant 0 : i32
    return %c0_i32, %c0_i32_0 : i32, i32
  }
  func.func @transform_7(%arg0: i32) -> (i32, i32, i32) {
    %c0_i32 = arith.constant 0 : i32
    %c0_i32_0 = arith.constant 0 : i32
    %c0_i32_1 = arith.constant 0 : i32
    return %arg0, %c0_i32, %c0_i32_0 : i32, i32, i32
  }
}

</mosaic_0001>

<bundles_post_ra>
// kernel: tpu_custom_call.1
= control target key start
LH: loop header
LB: loop body
LE: loop exit
PB: predicated region body
PF: predicated region fallthrough
CT: control target
= control target key end

     0   :  { %s2053_s0 = inlined_call_operand.vmem [shape: f32[2,8,256], index: 0, kind: input, shape index: {}]   ;;  %s2054_s1 = inlined_call_operand.hbm [shape: f32[2,8,256], index: 1, kind: input, shape index: {}]   ;;  %s2055_s2 = inlined_call_operand.hbm [shape: f32[2,8,256], index: 2, kind: input, shape index: {}]   ;;  %s2056_s3 = inlined_call_operand.hbm [shape: f32[9,256], index: 3, kind: input, shape index: {}]   ;;  %s2057_s4 = inlined_call_operand.vmem [shape: f32[8,9], index: 4, kind: input, shape index: {}]   ;;  %s2058_s5 = inlined_call_operand.vmem [shape: f32[16,8], index: 5, kind: input, shape index: {}]   ;;  %s2059_s6 = inlined_call_operand.vmem [shape: f32[16,1], index: 6, kind: input, shape index: {}]   ;;  %s2060_s7 = inlined_call_operand.hbm [shape: f32[2,16,256], index: 7, kind: output, shape index: {}]  }
   0x1   :  { %2068 = sst [smem:[#allocation16_spill]] %s2056_s3 }
   0x2   :  { %12 = vsyncpa [#allocation3], 0 }
   0x3   :  { %14 = vsyncpa [#allocation3 + $0x1], 0 }
   0x4   :  { %15 = vsyncpa [#allocation6], 0 }
   0x5   :  { %17 = vsyncpa [#allocation6 + $0x1], 0 }
   0x6   :  { %18 = vsyncpa [#allocation4], 0 }
   0x7   :  { %20 = vsyncpa [#allocation4 + $0x1], 0  ;;  %s1643_s24 = smov 0   ;;  %s1645_s25 = smov 0  }
   0x8   :  { %s1647_s26 = smov 0   ;;  %s1649_s27 = smov 0  }
   0x9 LB: > { %2069 = sst [smem:[#allocation13_spill]] %s1572_s26  ;;  %s1664_s28 = sadd.s32 4294967295, %s1576_s27   ;;  %s1576_s27 = sphi %s1649_s27, %s2087_s27   ;;  %s1572_s26 = sphi %s1647_s26, %s2089_s26   ;;  %s1568_s25 = sphi %s1645_s25, %s2091_s25   ;;  %s1564_s24 = sphi %s1643_s24, %s2090_s24  }
   0xa   : > { %s1269_s29 = sadd.s32 4294967294, %s1576_s27   ;;  %p72_p0 = scmp.ne.s32.totalorder %s1568_s25, %s1564_s24 }
   0xb   : > { %p2061_p1 = scmp.eq.s32.totalorder %s1664_s28, 0  ;;  %p212_p3 = scmp.eq.s32.totalorder %s1269_s29, 1 }
   0xc   : > { %p1270_p5 = scmp.ge.s32.totalorder %s1576_s27, 1  ;;  %p219_p7 = scmp.lt.s32.totalorder %s1576_s27, 3 }
   0xd   : > { %p1673_p4 = por %p2061_p1, %p72_p0  ;;  %p1678_p6 = por %p212_p3, %p72_p0 }
   0xe   : > { %p1683_p8 = pnand %p1270_p5, %p219_p7  ;;  %s1578_s10 = smov [#allocation7]  }
   0xf   : > { %s2070_s30 = scalar_select %p1673_p4, 1, 0 }
  0x10   : > { %s2071_s8 = scalar_select %p1678_p6, 1, 0 }
  0x11   : > { %s2072_s9 = scalar_select %p1683_p8, 1, 0 }
  0x12   : > { %s231_s11 = sshll.u32 %s1578_s10, 4  ;;  %p1331_p9 = pneg %p1683_p8  ;;  %s1687_s11 = int_to_ptr.vmem [resolvable:$true] %s231_s11 }
  0x13   : > { %s1699_s13 = sadd.s32 1, %s1576_s27   ;;  %s59_s14 = sadd.s32 1, %s1572_s26 }
  0x14   : > { %p1694_p11 = pnand %p1331_p9, %p2061_p1  ;;  %2074 = sst [smem:[#allocation14_spill]] %s1699_s13 }
  0x15   : > { %s56_s15 = ssub.s32 %s1576_s27, %s1699_s13  ;;  %s2075_s3 = sld [smem:[#allocation16_spill]] }
  0x16   : > { %p1416_p13 = pneg %p1694_p11 }
  0x1b   : > { %s1414_s18 = scalar_lea.hbm %s2075_s3, 512 }
  0x1c   : > { %p1415_p12 = scmp.ne.s32.totalorder %s2075_s3, %s1414_s18  ;;  %p1421_p5 = scmp.lt.u32.totalorder %s1414_s18, %s2075_s3 }
  0x1e   : > { %p1417_p0 = pnand %p1416_p13, %p1415_p12 }
  0x20   : > { %p1418_p3 = pneg %p1417_p0 }
  0x22   : > { %p1423_p7 = pnand %p1421_p5, %p1418_p3 }
  0x24   : > { %1426 = shalt.err (!%p1423_p7)
}
  0x25   : > { %s1427_s23 = scalar_lea.vmem %s1687_s11, 512  ;;  %p1435_p2 = scmp.lt.s32.totalorder %s1687_s11, %s1687_s11 }
  0x26   : > { %p1428_p9 = scmp.ne.s32.totalorder %s1687_s11, %s1427_s23  ;;  %p1436_p6 = scmp.lt.s32.totalorder %s1427_s23, %s1427_s23 }
  0x28   : > { %p1430_p10 = pnand %p1428_p9, %p1416_p13  ;;  %p1437_p4 = por %p1436_p6, %p1435_p2 }
  0x2a   : > { %p1431_p1 = pneg %p1430_p10 }
  0x2c   : > { %p1438_p8 = pnand %p1437_p4, %p1431_p1 }
  0x2e   : > { %1441 = shalt.err (!%p1438_p8)
}
  0x2f   : > { %s1579_s29 = smov 256   ;;  %s1580_s10 = smov 16  }
  0x30   : > { %1334 = dma.hbm_to_vmem [thread:$0]  (!%p1694_p11), %s2075_s3, 512, %s1687_s11, [#allocation6], %s1579_s29, %s1579_s29, %s1580_s10  }
  0x31   : > { %p57_p2 = scmp.eq.s32.totalorder %s56_s15, 0  ;;  %p66_p1 = scmp.ne.s32.totalorder %s1572_s26, %s1568_s25 }
  0x32   : > { %p67_p4 = scmp.eq.s32.totalorder %s1576_s27, 0  ;;  %p1347_p6 = scmp.lt.s32.totalorder %s1576_s27, 2 }
  0x33   : > { %s1730_s18 = scalar_select %p57_p2, %s1572_s26, %s59_s14  }
  0x34   : > { %p68_p8 = por %p67_p4, %p66_p1  ;;  %p2077_p10 = scmp.eq.s32.totalorder %s1664_s28, 1 }
  0x35   : > { %2076 = sst [smem:[#allocation15_spill]] %s1730_s18  ;;  %s262_s20 = sand.u32 1, %s1572_s26  }
  0x36   : > { %p1734_p12 = por %p2077_p10, %p66_p1  ;;  %s1293_s21 = sshll.u32 %s1576_s27, 8 }
  0x37   : > { %s1740_s22 = sshll.u32 %s262_s20, 4  ;;  %s1745_s11 = scalar_lea.hbm %s2054_s1, %s1293_s21 }
  0x38   : > { %s2078_s19 = scalar_select %p1734_p12, 1, 0 }
  0x39   : > { %s266_s14 = scalar_lea.vmem [#allocation2], %s1740_s22  ;;  %p1748_p11 = pnand %p1347_p6, %p68_p8 }
  0x3a   : > { %s274_s15 = sshll.u32 %s266_s14, 4  ;;  %s1757_s17 = scalar_lea.hbm %s2055_s2, %s1293_s21  ;;  %s1752_s15 = int_to_ptr.vmem [resolvable:$true] %s274_s15 }
  0x3b   : > { %s263_s12 = scalar_lea.sflag [#allocation3], %s262_s20  ;;  %s1442_s23 = scalar_lea.hbm %s1745_s11, 256 }
  0x3c   : > { %p1443_p13 = scmp.ne.s32.totalorder %s1745_s11, %s1442_s23  ;;  %p1444_p0 = pneg %p1748_p11 }
  0x3d   : > { %s1447_s18 = scalar_lea.hbm %s2054_s1, 512  ;;  %p1448_p7 = scmp.lt.u32.totalorder %s1745_s11, %s2054_s1 }
  0x3e   : > { %p1445_p3 = pnand %p1444_p0, %p1443_p13  ;;  %p1449_p9 = scmp.lt.u32.totalorder %s1447_s18, %s1442_s23 }
  0x3f   : > { %p1451_p1 = scmp.lt.u32.totalorder %s1442_s23, %s1745_s11 }
  0x40   : > { %p1446_p5 = pneg %p1445_p3  ;;  %p1450_p2 = por %p1449_p9, %p1448_p7 }
  0x42   : > { %p1452_p4 = por %p1451_p1, %p1450_p2 }
  0x44   : > { %p1453_p6 = pnand %p1452_p4, %p1446_p5 }
  0x46   : > { %1456 = shalt.err (!%p1453_p6)
}
  0x47   : > { %s1457_s20 = scalar_lea.vmem %s1752_s15, 256  ;;  %s1581_s3 = smov [#allocation2]  }
  0x48   : > { %p1458_p8 = scmp.ne.s32.totalorder %s1752_s15, %s1457_s20  ;;  %s1462_s21 = sshll.u32 %s1581_s3, 4  ;;  %s1463_s21 = int_to_ptr.vmem [resolvable:$false] %s1462_s21 }
  0x49   : > { %s1464_s26 = scalar_lea.vmem %s1463_s21, 512  ;;  %p1465_p3 = scmp.lt.s32.totalorder %s1752_s15, %s1463_s21 }
  0x4a   : > { %p1460_p10 = pnand %p1458_p8, %p1444_p0  ;;  %p1466_p7 = scmp.lt.s32.totalorder %s1464_s26, %s1457_s20 }
  0x4c   : > { %p1461_p13 = pneg %p1460_p10  ;;  %p1467_p9 = por %p1466_p7, %p1465_p3 }
  0x4e   : > { %p1468_p2 = pnand %p1467_p9, %p1461_p13 }
  0x50   : > { %1471 = shalt.err (!%p1468_p2)
}
  0x51   : > { %1338 = dma.hbm_to_vmem [thread:$0]  (!%p1748_p11), %s1745_s11, 256, %s1752_s15, %s263_s12  }
  0x52   : > { %s281_s13 = sand.u32 1, %s1576_s27   ;;  %s285_s18 = scalar_lea.vmem [#allocation5], %s1740_s22 }
  0x53   : > { %s293_s10 = sshll.u32 %s285_s18, 4  ;;  %s282_s16 = scalar_lea.sflag [#allocation6], %s281_s13  ;;  %s294_s10 = int_to_ptr.vmem [resolvable:$true] %s293_s10 }
  0x54   : > { %s1472_s23 = scalar_lea.hbm %s1757_s17, 256  ;;  %s1477_s3 = scalar_lea.hbm %s2055_s2, 512 }
  0x55   : > { %p1473_p5 = scmp.ne.s32.totalorder %s1757_s17, %s1472_s23  ;;  %p1478_p6 = scmp.lt.u32.totalorder %s1757_s17, %s2055_s2 }
  0x56   : > { %p1479_p8 = scmp.lt.u32.totalorder %s1477_s3, %s1472_s23  ;;  %p1481_p13 = scmp.lt.u32.totalorder %s1472_s23, %s1757_s17 }
  0x57   : > { %p1475_p1 = pnand %p1473_p5, %p1444_p0 }
  0x58   : > { %p1480_p10 = por %p1479_p8, %p1478_p6 }
  0x59   : > { %p1476_p4 = pneg %p1475_p1 }
  0x5a   : > { %p1482_p3 = por %p1481_p13, %p1480_p10 }
  0x5c   : > { %p1483_p7 = pnand %p1482_p3, %p1476_p4 }
  0x5e   : > { %1486 = shalt.err (!%p1483_p7)
}
  0x5f   : > { %s1487_s22 = scalar_lea.vmem %s294_s10, 256  ;;  %s1582_s11 = smov [#allocation5]  }
  0x60   : > { %p1488_p9 = scmp.ne.s32.totalorder %s294_s10, %s1487_s22  ;;  %s1492_s15 = sshll.u32 %s1582_s11, 4  ;;  %s1493_s15 = int_to_ptr.vmem [resolvable:$false] %s1492_s15 }
  0x61   : > { %s1494_s12 = scalar_lea.vmem %s1493_s15, 512  ;;  %p1495_p1 = scmp.lt.s32.totalorder %s294_s10, %s1493_s15 }
  0x62   : > { %p1490_p2 = pnand %p1488_p9, %p1444_p0  ;;  %p1496_p12 = scmp.lt.s32.totalorder %s1494_s12, %s1487_s22 }
  0x64   : > { %p1491_p5 = pneg %p1490_p2  ;;  %p1497_p6 = por %p1496_p12, %p1495_p1 }
  0x66   : > { %p1498_p8 = pnand %p1497_p6, %p1491_p5 }
  0x68   : > { %1501 = shalt.err (!%p1498_p8)
}
  0x69   : > { %1341 = dma.hbm_to_vmem [thread:$0]  (!%p1748_p11), %s1757_s17, 256, %s294_s10, %s282_s16  }
  0x6a   : > { %p2080_p4 = scmp.ne.s32.totalorder %s2072_s9, 0 }
  0x6b   : > { %s1808_s13 = sand.u32 (!%p2080_p4), 1, %s1568_s25   ;;  %p2081_p12 = scmp.ne.s32.totalorder (!%p2080_p4), %s2070_s30, 0 }
  0x6c   : > { %302 = sbr.rel (%p2080_p4) target bundleno = 573 (0x23d), region = 48  ;;  %s1280_s18 = sshll.u32 (!%p2080_p4), %s1808_s13, 4 }
  0x6d   : > { %s305_s23 = scalar_lea.sflag (!%p2080_p4), [#allocation3], %s1808_s13  ;;  %s1812_s14 = scalar_lea.vmem (!%p2080_p4), [#allocation2], %s1280_s18 }
  0x73   : > { %1547 = dma.done.wait (%p2081_p12), %s305_s23, 256  }
  0x74   : > { %1549 = vsyncadd (%p2081_p12), %s305_s23, 4294967040  ;;  %s313_s29 = sand.u32 1, %s1664_s28   ;;  %s1819_s17 = scalar_lea.vmem [#allocation5], %s1280_s18 }
  0x75   : > { %s314_s9 = scalar_lea.sflag [#allocation6], %s313_s29 }
  0x76   : > { %1551 = dma.done.wait (%p2081_p12), %s314_s9, 256  }
  0x77   : > { %1553 = vsyncadd (%p2081_p12), %s314_s9, 4294967040  ;;  %p2082_p11 = scmp.eq.s32.totalorder %s1664_s28, 0 }
  0x79   : > { %1555 = dma.done.wait (%p2082_p11), [#allocation6], 512   ;;  %p2083_p0 = pmov %p2082_p11 }
  0x7a   : > { %v1583_v0 = vmov 2   ;;  %v1584_v1 = vmov 1   ;;  %p362_p10 = scmp.lt.s32.totalorder %s1664_s28, 1  ;;  %v367_v2 = vld [vmem:[%s2057_s4] sm:$0xff]  ;;  %v1585_v3 = vmov 3   ;;  %v1586_v4 = vmov 5  }
  0x7b   : > { %1557 = vsyncadd (%p2083_p0), [#allocation6], 4294966784  ;;  %1405 = vset.pattern.permute.xlu1 %v1583_v0  ;;  %1404 = vset.pattern.permute.xlu0 %v1584_v1  ;;  %v493_v7 = vld [vmem:[%s1812_s14] sm:$0xff]  ;;  %v1587_v9 = vmov 4   ;;  %v1588_v10 = vmov 8   ;;  %v1589_v14 = vmov 6   ;;  %v381_v38 = vlaneseq }
  0x7c   : > { %s363_s10 = scalar_select %p362_p10, %s1664_s28, 1  ;;  %406 = vperm.xlu1 %1405, %v367_v2   ;;  %392 = vperm.xlu0 %1404, %v367_v2   ;;  %v497_v8 = vld [vmem:[%s1819_s17] sm:$0xff]  ;;  %v1590_v15 = vmov 0   ;;  %v494_v18 = vld [vmem:[%s1812_s14 + $0x8] sm:$0xff]  ;;  %v1591_v20 = vmov 7   ;;  %v1600_v25 = vmov 0.0  }
  0x7d   : > { %v499_v12 = vmul.f32 0.5, %v497_v8  ;;  %v498_v19 = vld [vmem:[%s1819_s17 + $0x8] sm:$0xff]  ;;  %s1592_s22 = smov 16   ;;  %s1593_s11 = smov 15   ;;  %v374_v24 = vld [vmem:[%s2059_s6] sm:$0xff]  ;;  %682 = vmatprep.mubr.f32.mxu1 %v1600_v25  ;;  %945 = vmatprep.mubr.f32.mxu0 %v1600_v25  ;;  %v382_v41 = vshrl.u32 %v381_v38, 7 }
  0x7e   : > { %s1295_s16 = sshll.u32 %s363_s10, 4  ;;  %v500_v22 = vmul.f32 0.5, %v498_v19  ;;  %s1594_s15 = smov 17   ;;  %v375_v26 = vld [vmem:[%s2059_s6 + $0x8] sm:$0xff]  ;;  %v372_v42 = vld [vmem:[%s2058_s5] sm:$0xff]  ;;  %vm609_vm0 = vcmask 64512  }
  0x7f   : > { %s366_s26 = scalar_lea.vmem %s2053_s0, %s1295_s16  ;;  %s1595_s12 = smov 1   ;;  %v611_v45 = vsel %vm609_vm0, %v372_v42, 0  ;;  %v411_v46 = vsub.s32 2, %v382_v41  ;;  %v373_v47 = vld [vmem:[%s2058_s5 + $0x8] sm:$0xff]  ;;  %v368_v48 = vld [vmem:[#allocation7] sm:$0xff]  ;;  %v397_v49 = vsub.s32 1, %v382_v41 }
  0x80   : > { %1406 = vset.pattern.permute.xlu1 %v1585_v3  ;;  %1408 = vset.pattern.permute.xlu0 %v1586_v4  ;;  %v489_v5 = vld [vmem:[%s366_s26] sm:$0xff]  ;;  %v490_v13 = vld [vmem:[%s366_s26 + $0x8] sm:$0xff]  ;;  %s1596_s18 = smov 127   ;;  %s1597_s23 = smov 113   ;;  %v425_v50 = vsub.s32 3, %v382_v41  ;;  %v439_v52 = vsub.s32 5, %v382_v41 }
  0x81   : > { %420 = vperm.xlu1 %1406, %v367_v2   ;;  %434 = vperm.xlu0 %1408, %v367_v2   ;;  %v491_v6 = vmul.f32 0.5, %v489_v5  ;;  %v492_v17 = vmul.f32 0.5, %v490_v13  ;;  %s1598_s14 = smov 112   ;;  %s1599_s29 = smov 111   ;;  %v369_v51 = vld [vmem:[#allocation7 + $0x8] sm:$0xff]  ;;  %v1899_v53 = vand.u32 4294901760, %v611_v45  ;;  %v412_v58 = vrot.slane %v368_v48, %v411_v46 }
  0x82   : > { %v453_v54 = vsub.s32 6, %v382_v41  ;;  %v383_v55 = vsub.s32 0, %v382_v41  ;;  %v614_v57 = vsel %vm609_vm0, %v373_v47, 0  ;;  %v1901_v59 = vand.u32 127, %v381_v38  ;;  %s1283_s26 = sshll.u32 %s1808_s13, 5  ;;  %p2084_p3 = scmp.ne.s32.totalorder %s2078_s19, 0 }
  0x83   : > { %v495_v11 = vadd.f32 %v493_v7, %v491_v6  ;;  %v496_v21 = vadd.f32 %v494_v18, %v492_v17  ;;  %v467_v60 = vsub.s32 7, %v382_v41  ;;  %v416_v61 = vrot.slane %v369_v51, %v411_v46 }
  0x84   : > { %v398_v62 = vrot.slane %v368_v48, %v397_v49  ;;  %v402_v63 = vrot.slane %v369_v51, %v397_v49  ;;  %v426_v0 = vrot.slane %v368_v48, %v425_v50  ;;  %v440_v3 = vrot.slane %v368_v48, %v439_v52 }
  0x85   : > { %1407 = vset.pattern.permute.xlu1 %v1587_v9  ;;  %1411 = vset.pattern.permute.xlu0 %v1588_v10  ;;  %v1839_v16 = vadd.f32 %v499_v12, %v495_v11  ;;  %v1847_v23 = vadd.f32 %v500_v22, %v496_v21  ;;  %v1904_v4 = vsub.f32 %v611_v45, %v1899_v53  ;;  %v1906_v5 = vand.u32 4294901760, %v614_v57 }
  0x86   : > { %504 = vperm.xlu1 %1407, %v367_v2   ;;  %476 = vperm.xlu0 %1411, %v367_v2   ;;  %v444_v6 = vrot.slane %v369_v51, %v439_v52  ;;  %v454_v7 = vrot.slane %v368_v48, %v453_v54  ;;  %v384_v8 = vrot.slane %v368_v48, %v383_v55  ;;  %vm515_vm1 = vcmp.lt.s32.totalorder %v1901_v59, 17 }
  0x87   : > { %v388_v9 = vrot.slane %v369_v51, %v383_v55  ;;  %v458_v11 = vrot.slane %v369_v51, %v453_v54  ;;  %v468_v12 = vrot.slane %v368_v48, %v467_v60  ;;  %v472_v13 = vrot.slane %v369_v51, %v467_v60 }
  0x88   : > { %vm526_vm2 = vcmp.lt.s32.totalorder %v1901_v59, 16  ;;  %vm535_vm3 = vcmp.lt.s32.totalorder %v1901_v59, 15  ;;  %vm546_vm4 = vcmp.lt.s32.totalorder %v1901_v59, 1  ;;  %vm557_vm5 = vcmp.lt.s32.totalorder %v1901_v59, 127 }
  0x89   : > { %vm568_vm6 = vcmp.lt.s32.totalorder %v1901_v59, 113  ;;  %vm579_vm7 = vcmp.lt.s32.totalorder %v1901_v59, 112  ;;  %vm590_vm8 = vcmp.lt.s32.totalorder %v1901_v59, 111 }
  0x8a   : > { %1409 = vset.pattern.permute.xlu1 %v1589_v14  ;;  %1412 = vset.pattern.permute.xlu0 %v1590_v15  ;;  %v685_v14 = vand.u32 4294901760, %v1904_v4 }
  0x8b   : > { %448 = vperm.xlu1 %1409, %v367_v2   ;;  %378 = vperm.xlu0 %1412, %v367_v2  }
  0x8f   : > { %1410 = vset.pattern.permute.xlu1 %v1591_v20  ;;  %522 = vrot.lane.b32.xlu0 %v1839_v16, %s1592_s22 }
  0x90   : > { %462 = vperm.xlu1 %1410, %v367_v2   ;;  %v430_v2 = vrot.slane %v369_v51, %v425_v50 }
  0x93   : > { %531 = vrot.lane.b32.xlu0 %v1839_v16, %s1593_s11 }
  0x94   : > { %509 = vrot.lane.b32.xlu1 %v1839_v16, %s1594_s15 }
  0x95   : > { %1413 = vset.pattern.permute.xlu1 %v1590_v15  ;;  %v1917_v15 = vsub.f32 %v614_v57, %v1906_v5  ;;  %v1286_v57 = vld [vmem:[#allocation7 + $0x10] ss:$0 sm:$0xff] }
  0x97   : > { %542 = vrot.lane.b32.xlu0 %v1839_v16, %s1595_s12 }
  0x98   : > { %511 = vrot.lane.b32.xlu1 %v1847_v23, %s1594_s15 }
  0x9b   : > { %553 = vrot.lane.b32.xlu0 %v1839_v16, %s1596_s18 }
  0x9c   : > { %524 = vrot.lane.b32.xlu1 %v1847_v23, %s1592_s22 }
  0x9f   : > { %564 = vrot.lane.b32.xlu0 %v1839_v16, %s1597_s23 }
  0xa0   : > { %533 = vrot.lane.b32.xlu1 %v1847_v23, %s1593_s11  ;;  %s361_s11 = scalar_lea.vmem [#allocation8], %s1283_s26 }
  0xa1   : > { %s1152_s15 = sshll.u32 %s361_s11, 4  ;;  %s2003_s15 = int_to_ptr.vmem [resolvable:$true] %s1152_s15 }
  0xa2   : > { %s1502_s9 = scalar_lea.vmem %s2003_s15, 512 }
  0xa3   : > { %575 = vrot.lane.b32.xlu0 %v1839_v16, %s1598_s14  ;;  %p1503_p13 = scmp.ne.s32.totalorder %s2003_s15, %s1502_s9 }
  0xa4   : > { %544 = vrot.lane.b32.xlu1 %v1847_v23, %s1595_s12  ;;  %s1296_s12 = sshll.u32 %s1664_s28, 9  ;;  %s1601_s28 = smov [#allocation8]  }
  0xa5   : > { %p1504_p7 = pnand %p1503_p13, %p2084_p3  ;;  %s1506_s17 = sshll.u32 %s1601_s28, 4  ;;  %s1507_s17 = int_to_ptr.vmem [resolvable:$false] %s1506_s17 }
  0xa6   : > { %s1508_s10 = scalar_lea.vmem %s1507_s17, 1024  ;;  %p1509_p2 = scmp.lt.s32.totalorder %s2003_s15, %s1507_s17 }
  0xa7   : > { %586 = vrot.lane.b32.xlu0 %v1839_v16, %s1599_s29  ;;  %p1505_p9 = pneg %p1504_p7  ;;  %p1510_p5 = scmp.lt.s32.totalorder %s1508_s10, %s1502_s9 }
  0xa8   : > { %555 = vrot.lane.b32.xlu1 %v1847_v23, %s1596_s18 }
  0xa9   : > { %p1511_p1 = por %p1510_p5, %p1509_p2 }
  0xab   : > { %601 = vperm.xlu0 %1412, %v374_v24   ;;  %p1512_p6 = pnand %p1511_p1, %p1505_p9 }
  0xac   : > { %566 = vrot.lane.b32.xlu1 %v1847_v23, %s1597_s23 }
  0xb0   : > { %577 = vrot.lane.b32.xlu1 %v1847_v23, %s1598_s14  ;;  %s2008_s14 = scalar_lea.hbm %s2060_s7, %s1296_s12 }
  0xb4   : > { %588 = vrot.lane.b32.xlu1 %v1847_v23, %s1599_s29  ;;  %s1139_s29 = scalar_lea.sflag [#allocation4], %s1808_s13 }
  0xb8   : > { %606 = vperm.xlu1 %1413, %v375_v26  }
  0xfb   : > { %v407_v27 = vpop.permute.xlu1 %406  ;;  %v1871_v28 = vpop.permute.xlu0 %392 }
  0xfc   : > { %v417_v17 = vmul.f32 %v412_v58, %v407_v27  ;;  %v418_v18 = vmul.f32 %v416_v61, %v407_v27  ;;  %v403_v24 = vmul.f32 %v398_v62, %v1871_v28  ;;  %v404_v26 = vmul.f32 %v402_v63, %v1871_v28  ;;  %v1287_v58 = vld [vmem:[#allocation7 + $0x18] ss:$0 sm:$0xff] }
 0x100   : > { %v1873_v29 = vpop.permute.xlu1 %420  ;;  %v1875_v30 = vpop.permute.xlu0 %434 }
 0x101   : > { %v431_v42 = vmul.f32 %v426_v0, %v1873_v29  ;;  %v432_v45 = vmul.f32 %v430_v2, %v1873_v29  ;;  %v445_v27 = vmul.f32 %v440_v3, %v1875_v30 }
 0x105   : > { %v1877_v31 = vpop.permute.xlu1 %504  ;;  %v1879_v32 = vpop.permute.xlu0 %476 }
 0x106   : > { %v507_v46 = vmul.f32 %v1877_v31, %v1839_v16  ;;  %v508_v28 = vmul.f32 %v1877_v31, %v1847_v23 }
 0x10a   : > { %v1881_v33 = vpop.permute.xlu1 %448  ;;  %v379_v34 = vpop.permute.xlu0 %378 }
 0x10b   : > { %v389_v19 = vmul.f32 %v384_v8, %v379_v34  ;;  %v390_v20 = vmul.f32 %v388_v9, %v379_v34  ;;  %v446_v34 = vmul.f32 %v444_v6, %v1875_v30  ;;  %v459_v47 = vmul.f32 %v454_v7, %v1881_v33 }
 0x10c   : > { %v487_v9 = vmul.f32 %v1286_v57, %v1879_v32 }
 0x10e   : > { %v1883_v35 = vpop.permute.xlu0 %522 }
 0x10f   : > { %v1885_v36 = vpop.permute.xlu1 %462 }
 0x110   : > { %v473_v16 = vmul.f32 %v468_v12, %v1885_v36  ;;  %v474_v50 = vmul.f32 %v472_v13, %v1885_v36 }
 0x112   : > { %v1887_v39 = vpop.permute.xlu0 %531 }
 0x113   : > { %v510_v37 = vpop.permute.xlu1 %509 }
 0x116   : > { %v1892_v43 = vpop.permute.xlu0 %542 }
 0x117   : > { %v512_v40 = vpop.permute.xlu1 %511 }
 0x118   : > { %v516_v38 = vsel %vm515_vm1, %v510_v37, %v512_v40  ;;  %v517_v41 = vsel %vm515_vm1, %v512_v40, %v510_v37  ;;  %v460_v37 = vmul.f32 %v458_v11, %v1881_v33 }
 0x119   : > { %v518_v40 = vmul.f32 %v517_v41, %v389_v19  ;;  %v519_v48 = vmul.f32 %v516_v38, %v390_v20 }
 0x11a   : > { %v554_v1 = vpop.permute.xlu0 %553 }
 0x11b   : > { %v1894_v44 = vpop.permute.xlu1 %524  ;;  %v520_v60 = vadd.f32 %v518_v40, %v507_v46  ;;  %v521_v61 = vadd.f32 %v519_v48, %v508_v28 }
 0x11c   : > { %v527_v33 = vsel %vm526_vm2, %v1883_v35, %v1894_v44 }
 0x11d   : > { %v530_v6 = vmul.f32 %v527_v33, %v404_v26 }
 0x11e   : > { %v565_v21 = vpop.permute.xlu0 %564 }
 0x11f   : > { %v534_v56 = vpop.permute.xlu1 %533 }
 0x120   : > { %v536_v29 = vsel %vm535_vm3, %v1887_v39, %v534_v56  ;;  %v537_v30 = vsel %vm535_vm3, %v534_v56, %v1887_v39  ;;  %v528_v39 = vsel %vm526_vm2, %v1894_v44, %v1883_v35 }
 0x121   : > { %v538_v54 = vmul.f32 %v537_v30, %v417_v17  ;;  %v539_v55 = vmul.f32 %v536_v29, %v418_v18  ;;  %v529_v3 = vmul.f32 %v528_v39, %v403_v24 }
 0x122   : > { %v576_v51 = vpop.permute.xlu0 %575 }
 0x123   : > { %v545_v10 = vpop.permute.xlu1 %544  ;;  %v540_v11 = vadd.f32 %v538_v54, %v520_v60  ;;  %v541_v12 = vadd.f32 %v539_v55, %v521_v61 }
 0x124   : > { %v547_v23 = vsel %vm546_vm4, %v1892_v43, %v545_v10  ;;  %v548_v31 = vsel %vm546_vm4, %v545_v10, %v1892_v43  ;;  %v488_v10 = vmul.f32 %v1287_v58, %v1879_v32 }
 0x125   : > { %v549_v35 = vmul.f32 %v548_v31, %v431_v42  ;;  %v550_v44 = vmul.f32 %v547_v23, %v432_v45 }
 0x126   : > { %v587_v18 = vpop.permute.xlu0 %586 }
 0x127   : > { %v556_v22 = vpop.permute.xlu1 %555  ;;  %v551_v13 = vadd.f32 %v549_v35, %v529_v3  ;;  %v552_v17 = vadd.f32 %v550_v44, %v530_v6 }
 0x128   : > { %v558_v36 = vsel %vm557_vm5, %v554_v1, %v556_v22  ;;  %v559_v52 = vsel %vm557_vm5, %v556_v22, %v554_v1 }
 0x129   : > { %v560_v63 = vmul.f32 %v558_v36, %v445_v27  ;;  %v561_v0 = vmul.f32 %v559_v52, %v446_v34  ;;  %v686_v27 = vsub.f32 %v1904_v4, %v685_v14  ;;  %v696_v34 = vand.u32 4294901760, %v1917_v15 }
 0x12b   : > { %v567_v49 = vpop.permute.xlu1 %566  ;;  %v562_v22 = vadd.f32 %v560_v63, %v540_v11  ;;  %v563_v38 = vadd.f32 %v561_v0, %v541_v12  ;;  %v687_v59 = vand.u32 4294901760, %v686_v27 }
 0x12c   : > { %v569_v43 = vsel %vm568_vm6, %v565_v21, %v567_v49  ;;  %v570_v56 = vsel %vm568_vm6, %v567_v49, %v565_v21  ;;  %v697_v49 = vsub.f32 %v1917_v15, %v696_v34 }
 0x12d   : > { %v571_v7 = vmul.f32 %v569_v43, %v459_v47  ;;  %v572_v8 = vmul.f32 %v570_v56, %v460_v37 }
 0x12e   : > { %v698_v33 = vand.u32 4294901760, %v697_v49 }
 0x12f   : > { %v578_v62 = vpop.permute.xlu1 %577  ;;  %v573_v41 = vadd.f32 %v571_v7, %v551_v13  ;;  %v574_v42 = vadd.f32 %v572_v8, %v552_v17 }
 0x130   : > { %v580_v1 = vsel %vm579_vm7, %v576_v51, %v578_v62  ;;  %v581_v2 = vsel %vm579_vm7, %v578_v62, %v576_v51 }
 0x131   : > { %v582_v19 = vmul.f32 %v580_v1, %v473_v16  ;;  %v583_v20 = vmul.f32 %v581_v2, %v474_v50 }
 0x133   : > { %v589_v21 = vpop.permute.xlu1 %588  ;;  %v584_v46 = vadd.f32 %v582_v19, %v562_v22  ;;  %v585_v28 = vadd.f32 %v583_v20, %v563_v38 }
 0x134   : > { %v591_v24 = vsel %vm590_vm8, %v587_v18, %v589_v21  ;;  %v592_v26 = vsel %vm590_vm8, %v589_v21, %v587_v18 }
 0x135   : > { %v593_v45 = vmul.f32 %v591_v24, %v487_v9  ;;  %v594_v32 = vmul.f32 %v592_v26, %v488_v10 }
 0x137   : > { %v595_v47 = vadd.f32 %v593_v45, %v573_v41  ;;  %v596_v37 = vadd.f32 %v594_v32, %v574_v42 }
 0x139   : > { %v597_v40 = vadd.f32 %v595_v47, %v584_v46  ;;  %v598_v48 = vadd.f32 %v596_v37, %v585_v28 }
 0x13b   : > { %v616_v29 = vand.u32 4294901760, %v598_v48  ;;  %v618_v30 = vand.u32 4294901760, %v597_v40 }
 0x13d   : > { %617 = vmatprep.subr.mxu1 %v616_v29  ;;  %880 = vmatprep.subr.mxu0 %v616_v29  ;;  %v706_v16 = vsub.f32 %v598_v48, %v616_v29  ;;  %v712_v50 = vsub.f32 %v597_v40, %v618_v30 }
 0x13e   : > { %619 = vmatpush1.msra.mxu1 %v618_v30  ;;  %882 = vmatpush1.msra.mxu0 %v618_v30 }
 0x13f   : > { %688 = vmatmul.mubr.f32.vlgmr.msra.gmra.mrb[0].mxu1 %v687_v59  ;;  %949 = vmatmul.mubr.f32.vlgmr.msra.gmra.mrb[0].mxu0 %v685_v14  ;;  %v707_v23 = vand.u32 4294901760, %v706_v16  ;;  %v713_v31 = vand.u32 4294901760, %v712_v50  ;;  %v602_v14 = vpop.permute.xlu0 %601 }
 0x140   : > { %693 = vmatprep.mubr.f32.mxu1 %v1600_v25  ;;  %954 = vmatprep.mubr.f32.mxu0 %v1600_v25 }
 0x141   : > { %967 = vmatprep.subr.mxu0 %v707_v23  ;;  %v708_v39 = vsub.f32 %v706_v16, %v707_v23  ;;  %v714_v51 = vsub.f32 %v712_v50, %v713_v31 }
 0x142   : > { %971 = vmatpush1.msra.mxu0 %v713_v31 }
 0x143   : > { %699 = vmatmul.mubr.f32.gmra.mrb[2].mxu1 %v698_v33  ;;  %958 = vmatmul.mubr.f32.gmra.mrb[2].mxu0 %v696_v34  ;;  %v709_v36 = vand.u32 4294901760, %v708_v39  ;;  %v715_v52 = vand.u32 4294901760, %v714_v51 }
 0x144   : > { %1050 = vmatprep.subr.mxu0 %v616_v29  ;;  %779 = vmatprep.mubr.f32.mxu1 %v1600_v25 }
 0x145   : > { %710 = vmatprep.subr.mxu1 %v709_v36  ;;  %1034 = vmatprep.mubr.f32.mxu0 %v1600_v25 }
 0x146   : > { %716 = vmatpush1.msra.mxu1 %v715_v52 }
 0x147   : > { %781 = vmatmul.mubr.f32.vlgmr.msra.gmra.mrb[0].mxu1 %v1899_v53  ;;  %796 = vmatprep.subr.mxu1 %v706_v16 }
 0x148   : > { %1036 = vmatmul.mubr.f32.vlgmr.msra.gmra.mrb[0].mxu0 %v1899_v53  ;;  %799 = vmatpush1.msra.mxu1 %v712_v50 }
 0x149   : > { %1052 = vmatpush1.msra.mxu0 %v618_v30  ;;  %786 = vmatprep.mubr.f32.mxu1 %v1600_v25 }
 0x14a   : > { %1041 = vmatprep.mubr.f32.mxu0 %v1600_v25 }
 0x14b   : > { %788 = vmatmul.mubr.f32.gmra.mrb[2].mxu1 %v1906_v5 }
 0x14c   : > { %1043 = vmatmul.mubr.f32.gmra.mrb[2].mxu0 %v1906_v5  ;;  %862 = vmatprep.mubr.f32.mxu1 %v1600_v25 }
 0x14d   : > { %1115 = vmatprep.mubr.f32.mxu0 %v1600_v25 }
 0x14f   : > { %865 = vmatmul.mubr.f32.vlgmr.msra.gmra.mrb[0].mxu1 %v1904_v4  ;;  %v607_v4 = vpop.permute.xlu1 %606 }
 0x150   : > { %1117 = vmatmul.mubr.f32.vlgmr.msra.gmra.mrb[0].mxu0 %v1899_v53  ;;  %870 = vmatprep.mubr.f32.mxu1 %v1600_v25 }
 0x151   : > { %1122 = vmatprep.mubr.f32.mxu0 %v1600_v25 }
 0x153   : > { %873 = vmatmul.mubr.f32.gmra.mrb[2].mxu1 %v1917_v15 }
 0x154   : > { %1124 = vmatmul.mubr.f32.gmra.mrb[2].mxu0 %v1906_v5 }
 0x222   : > { %v866_v54 = vpop.f32.mrb[0].mxu1 }
 0x223   : > { %v1297_v55 = vadd.f32 %v866_v54, %v602_v14  ;;  %v1118_v43 = vpop.f32.mrb[0].mxu0  ;;  %v868_v56 = vpop.f32.mrb[1].mxu1 }
 0x224   : > { %v1299_v57 = vadd.f32 %v868_v56, %v602_v14  ;;  %v1120_v58 = vpop.f32.mrb[1].mxu0 }
 0x225   : > { %v1298_v60 = vadd.f32 %v1297_v55, %v1118_v43 }
 0x226   : > { %v1300_v53 = vadd.f32 %v1299_v57, %v1120_v58  ;;  %v874_v61 = vpop.f32.mrb[2].mxu1 }
 0x227   : > { %v1130_v35 = vmax.f32 %v1298_v60, 0.0  ;;  %v1301_v44 = vadd.f32 %v874_v61, %v607_v4  ;;  %v1125_v25 = vpop.f32.mrb[2].mxu0  ;;  %v876_v62 = vpop.f32.mrb[3].mxu1 }
 0x228   : > { %v1131_v5 = vmax.f32 %v1300_v53, 0.0  ;;  %v1303_v15 = vadd.f32 %v876_v62, %v607_v4  ;;  %v1127_v63 = vpop.f32.mrb[3].mxu0 }
 0x229   : > { %1134 = vst [vmem:[%s361_s11] sm:$0xff] %v1130_v35  ;;  %v1302_v0 = vadd.f32 %v1301_v44, %v1125_v25 }
 0x22a   : > { %1135 = vst [vmem:[%s361_s11 + $0x8] sm:$0xff] %v1131_v5  ;;  %v1304_v1 = vadd.f32 %v1303_v15, %v1127_v63 }
 0x22b   : > { %v1132_v2 = vmax.f32 %v1302_v0, 0.0 }
 0x22c   : > { %v1133_v3 = vmax.f32 %v1304_v1, 0.0 }
 0x22d   : > { %1136 = vst [vmem:[%s361_s11 + $0x10] sm:$0xff] %v1132_v2 }
 0x22e   : > { %1137 = vst [vmem:[%s361_s11 + $0x18] sm:$0xff] %v1133_v3 }
 0x22f   : > { %1515 = shalt.err (!%p1512_p6)
}
 0x230   : > { %s1516_s16 = scalar_lea.hbm %s2008_s14, 512  ;;  %s1520_s3 = scalar_lea.hbm %s2060_s7, 1024 }
 0x231   : > { %p1517_p8 = scmp.ne.s32.totalorder %s2008_s14, %s1516_s16  ;;  %p1521_p11 = scmp.lt.u32.totalorder %s2008_s14, %s2060_s7 }
 0x232   : > { %p1522_p0 = scmp.lt.u32.totalorder %s1520_s3, %s1516_s16  ;;  %p1524_p13 = scmp.lt.u32.totalorder %s1516_s16, %s2008_s14 }
 0x233   : > { %p1518_p4 = pnand %p1517_p8, %p2084_p3 }
 0x234   : > { %p1523_p10 = por %p1522_p0, %p1521_p11 }
 0x235   : > { %p1519_p12 = pneg %p1518_p4 }
 0x236   : > { %p1525_p7 = por %p1524_p13, %p1523_p10 }
 0x238   : > { %p1526_p9 = pnand %p1525_p7, %p1519_p12 }
 0x23a   : > { %1529 = shalt.err (!%p1526_p9)
}
 0x23b   : > { %s1602_s11 = smov 256  }
 0x23c   : > { %1329 = dma.vmem_to_hbm [thread:$0]  (%p2084_p3), %s2003_s15, 512, %s2008_s14, %s1139_s29, %s1602_s11, %s1602_s11, %s1592_s22  }
 0x23d PF: > { %s1167_s12 = sand.u32 1, %s1564_s24   ;;  %p2085_p2 = scmp.ne.s32.totalorder %s2071_s8, 0 }
 0x23e   : > { %p2086_p5 = scmp.ge.s32.totalorder %s1576_s27, 2  ;;  %s1168_s18 = scalar_lea.sflag [#allocation4], %s1167_s12 }
 0x240   : > { %p1343_p1 = pnand %p2086_p5, %p2085_p2 }
 0x242   : > { %1559 = dma.done.wait (!%p1343_p1), %s1168_s18, 512  }
 0x243   : > { %1561 = vsyncadd (!%p1343_p1), %s1168_s18, 4294966784  ;;  %s2087_s27 = sld [smem:[#allocation14_spill]]  ;;  %s2088_s19 = sld [smem:[#allocation13_spill]] }
 0x244   : > { %s2089_s26 = sld [smem:[#allocation15_spill]]  ;;  %s2090_s24 = smov %s1568_s25 }
 0x249   : > { %p23_p6 = scmp.ge.s32.totalorder %s2087_s27, 4   ;;  %s2091_s25 = smov %s2088_s19 }
 0x24b   :  { %25 = sbr.rel (!%p23_p6) target bundleno = 9 (0x9), region = 113 }
 0x252   :  { %1173 = vsyncpa [#allocation3], 1 }
 0x253   :  { %1175 = vsyncpa [#allocation3 + $0x1], 1 }
 0x254   :  { %1176 = vsyncpa [#allocation6], 1 }
 0x255   :  { %1178 = vsyncpa [#allocation6 + $0x1], 1 }
 0x256   :  { %1179 = vsyncpa [#allocation4], 1 }
 0x257   :  { %1181 = vsyncpa [#allocation4 + $0x1], 1 }

</bundles_post_ra>
